<compile_context>
chip_gen: v6e
topology: v6e:2x2x1
jax: 0.10.0
libtpu: 0.0.40
codegen_flags: <defaults>
</compile_context>

<pallas_src>
import functools

import jax
import jax.numpy as jnp
import numpy as np
from jax.experimental import pallas as pl
from jax.experimental.pallas import tpu as pltpu


def _rtdetr_postprocess_kernel(feat_ref, out_ref, count_ref, *,
                               score_threshold, iou_threshold):
    """Confidence normalization + cxcywh->xyxy + score filter + greedy NMS.

    feat_ref : (8, N) f32 VMEM  rows [cx, cy, w, h, person_conf, 0, 0, 0], boxes on lanes
    out_ref  : (8, N) f32 VMEM  rows [x1, y1, x2, y2, score, 0, 0, 0]; lane k holds the
                                k-th kept detection (decreasing score), other lanes zero
    count_ref: (1, 1) i32 SMEM  number of kept boxes K
    """
    n = feat_ref.shape[1]
    neg_inf = jnp.float32(-jnp.inf)

    cx = feat_ref[0:1, :]
    cy = feat_ref[1:2, :]
    w = feat_ref[2:3, :]
    h = feat_ref[3:4, :]
    conf = feat_ref[4:5, :]

    # rtdetr_out_splitter: person_conf / person_conf.max()  (one-time exact divide)
    conf = conf / jnp.max(conf, axis=1, keepdims=True)

    # cxcywh2xyxy (torchvision box_convert semantics)
    x1 = cx - 0.5 * w
    y1 = cy - 0.5 * h
    x2 = cx + 0.5 * w
    y2 = cy + 0.5 * h
    area = (x2 - x1) * (y2 - y1)

    # Stacked, sublane-dense box block.  Rows 2/3 are negated so the intersection
    # corners (max/max/min/min) collapse into a single full-width max per step.
    boxes = jnp.concatenate(
        [x1, y1, -x2, -y2, area, jnp.zeros((3, n), jnp.float32)], axis=0)  # (8, N)

    lane = jax.lax.broadcasted_iota(jnp.int32, (1, n), 1)   # box index along lanes
    sub8 = jax.lax.broadcasted_iota(jnp.int32, (8, 1), 0)   # output row index
    # out_col = col * sign + best * score_slot maps the extracted column
    # [x1, y1, -x2, -y2, area, 0, 0, 0] to the output row [x1, y1, x2, y2, score, 0, 0, 0].
    sign = jnp.where(sub8 < 2, 1.0, jnp.where(sub8 < 4, -1.0, 0.0)).astype(jnp.float32)
    score_slot = (sub8 == 4).astype(jnp.float32)

    # Score-threshold filter: boxes below threshold are never NMS candidates.
    scores0 = jnp.where(conf >= score_threshold, conf, neg_inf)     # (1, N)
    best0 = jnp.max(scores0, axis=1, keepdims=True)                 # (1, 1)
    out0 = jnp.zeros((8, n), jnp.float32)

    def cond(carry):
        step, best, _, _ = carry
        # Early exit once no candidate is left above threshold (K << N iterations).
        return jnp.logical_and(step < n, best[0, 0] >= score_threshold)

    def body(carry):
        step, best, scores, out = carry

        # Lowest-index box achieving the max score (tie-break like a stable sort).
        idx = jnp.min(jnp.where(scores >= best, lane, n), axis=1, keepdims=True)
        sel = lane == idx                                           # (1, N) one-hot

        # Single fused extraction of [bx1, by1, -bx2, -by2, barea] for the winner.
        col = jnp.sum(jnp.where(sel, boxes, 0.0), axis=1, keepdims=True)   # (8, 1)

        # Intersection corners in one full-width max (negate trick replaces the mins).
        corners = jnp.maximum(boxes, col)                           # (8, N)
        iw = -(corners[0:1, :] + corners[2:3, :])                   # ix2 - ix1
        ih = -(corners[1:2, :] + corners[3:4, :])                   # iy2 - iy1
        inter = jnp.maximum(iw, 0.0) * jnp.maximum(ih, 0.0)         # (1, N)
        union = area + col[4:5, :] - inter                          # (1, N)

        # Divide-free IoU test.  For union > 0 this is exactly iou > thr; for
        # union <= 0 the reference divide yields iou <= 0 (never suppressed),
        # which the `union > 0` guard reproduces.
        suppress = jnp.logical_or(
            sel, jnp.logical_and(union > 0.0, inter > iou_threshold * union))
        new_scores = jnp.where(suppress, neg_inf, scores)
        new_best = jnp.max(new_scores, axis=1, keepdims=True)

        # Lane-dense output write: kept detection `step` lands on lane `step`.
        out_col = col * sign + best * score_slot                    # (8, 1)
        new_out = jnp.where(lane == step, out_col, out)             # (8, N)
        return step + 1, new_best, new_scores, new_out

    final_step, _, _, final_out = jax.lax.while_loop(
        cond, body, (jnp.int32(0), best0, scores0, out0))

    out_ref[...] = final_out          # single full-width, lane-dense store
    count_ref[0, 0] = final_step


def rtdetr_postprocess(rtdetr_raw_out, score_threshold=0.5, iou_threshold=0.5):
    """Pallas TPU forward of RTDETR_postprocess.

    Returns (boxes_and_scores, num_kept):
      boxes_and_scores : (N, 5) f32; rows [0, num_kept) are the NMS survivors
                         ([x1, y1, x2, y2, score], decreasing score), rest are zero.
      num_kept         : int32 scalar.
    """
    if rtdetr_raw_out.ndim != 3 or rtdetr_raw_out.shape[0] != 1:
        raise ValueError("expected rtdetr_raw_out of shape (1, num_queries, >=5)")
    if rtdetr_raw_out.shape[-1] < 5:
        raise ValueError("last dim must hold [cx, cy, w, h, person_conf, ...]")

    x = rtdetr_raw_out[0].astype(jnp.float32)        # squeeze(0) -> (N, F)
    n = x.shape[0]
    # Lane-dense layout: one row per feature, the N boxes run along the 128-lane
    # axis, padded to 8 sublanes.  Wrapper-side transpose is pure layout plumbing.
    feats = jnp.zeros((8, n), jnp.float32).at[:5, :].set(x[:, :5].T)

    kernel = functools.partial(
        _rtdetr_postprocess_kernel,
        score_threshold=float(score_threshold),
        iou_threshold=float(iou_threshold),
    )
    boxes_lane, count = pl.pallas_call(
        kernel,
        out_shape=(
            jax.ShapeDtypeStruct((8, n), jnp.float32),
            jax.ShapeDtypeStruct((1, 1), jnp.int32),
        ),
        in_specs=[pl.BlockSpec(memory_space=pltpu.MemorySpace.VMEM)],
        out_specs=(
            pl.BlockSpec(memory_space=pltpu.MemorySpace.VMEM),
            pl.BlockSpec(memory_space=pltpu.MemorySpace.SMEM),
        ),
    )(feats)
    boxes_scores = boxes_lane.T[:, :5]               # (N, 5) caller-facing view
    return boxes_scores, count[0, 0]


def _reference_postprocess(raw_np, score_threshold=0.5, iou_threshold=0.5):
    """Pure NumPy re-implementation of the PyTorch reference (greedy NMS)."""
    x = np.asarray(raw_np, dtype=np.float32)[0]
    cx, cy, w, h = x[:, 0], x[:, 1], x[:, 2], x[:, 3]
    conf = x[:, 4]
    conf = (conf / conf.max()).astype(np.float32)
    x1 = (cx - 0.5 * w).astype(np.float32)
    y1 = (cy - 0.5 * h).astype(np.float32)
    x2 = (cx + 0.5 * w).astype(np.float32)
    y2 = (cy + 0.5 * h).astype(np.float32)
    area = ((x2 - x1) * (y2 - y1)).astype(np.float32)
    n = x.shape[0]
    scores = np.where(conf >= score_threshold, conf, -np.inf).astype(np.float32)
    rows = []
    for _ in range(n):
        best = scores.max()
        if not best >= score_threshold:
            break
        idx = int(np.min(np.where(scores >= best, np.arange(n), n)))
        ix1 = np.maximum(x1, x1[idx])
        iy1 = np.maximum(y1, y1[idx])
        ix2 = np.minimum(x2, x2[idx])
        iy2 = np.minimum(y2, y2[idx])
        inter = np.maximum(ix2 - ix1, 0.0) * np.maximum(iy2 - iy1, 0.0)
        with np.errstate(divide="ignore", invalid="ignore"):
            iou = inter / (area + area[idx] - inter)
        rows.append([x1[idx], y1[idx], x2[idx], y2[idx], scores[idx]])
        scores = np.where((iou > iou_threshold) | (np.arange(n) == idx),
                          -np.inf, scores).astype(np.float32)
    return np.asarray(rows, dtype=np.float32).reshape(-1, 5)


if __name__ == "__main__":
    key = jax.random.PRNGKey(0)
    num_queries, num_feats = 128, 8            # (1, num_queries, 4 box + class logits)
    raw = jax.random.normal(key, (1, num_queries, num_feats), dtype=jnp.float32)

    boxes_scores, num_kept = rtdetr_postprocess(raw)
    jax.block_until_ready((boxes_scores, num_kept))

    got = np.asarray(boxes_scores)
    k = int(num_kept)
    ref = _reference_postprocess(np.asarray(raw))

    assert got.shape == (num_queries, 5) and got.dtype == np.float32
    assert k == ref.shape[0], (k, ref.shape[0])
    if k > 0:
        np.testing.assert_allclose(got[:k], ref, rtol=1e-4, atol=1e-4)
    assert np.all(got[k:] == 0.0)

    print("KERNEL_OK")
</pallas_src>

<mosaic_0001>
module attributes {stable_mosaic.version = 11 : i64} {
  func.func @_rtdetr_postprocess_kernel(%arg0: memref<8x128xf32, #tpu.memory_space<vmem>>, %arg1: memref<8x128xf32, #tpu.memory_space<vmem>>, %arg2: memref<1x1xi32, #tpu.memory_space<smem>>) attributes {dimension_semantics = [], scalar_prefetch = 0 : i64, scratch_operands = 0 : i64, tpu.core_type = #tpu.core_type<tc>} {
    %c0 = arith.constant 0 : index
    %c0_0 = arith.constant 0 : index
    %0 = vector.load %arg0[%c0, %c0_0] : memref<8x128xf32, #tpu.memory_space<vmem>>, vector<1x128xf32>
    %c1 = arith.constant 1 : index
    %c0_1 = arith.constant 0 : index
    %1 = vector.load %arg0[%c1, %c0_1] : memref<8x128xf32, #tpu.memory_space<vmem>>, vector<1x128xf32>
    %c2 = arith.constant 2 : index
    %c0_2 = arith.constant 0 : index
    %2 = vector.load %arg0[%c2, %c0_2] : memref<8x128xf32, #tpu.memory_space<vmem>>, vector<1x128xf32>
    %c3 = arith.constant 3 : index
    %c0_3 = arith.constant 0 : index
    %3 = vector.load %arg0[%c3, %c0_3] : memref<8x128xf32, #tpu.memory_space<vmem>>, vector<1x128xf32>
    %c4 = arith.constant 4 : index
    %c0_4 = arith.constant 0 : index
    %4 = vector.load %arg0[%c4, %c0_4] : memref<8x128xf32, #tpu.memory_space<vmem>>, vector<1x128xf32>
    %cst = arith.constant dense<0xFF800000> : vector<1xf32>
    %5 = vector.multi_reduction <maximumf>, %4, %cst [1] : vector<1x128xf32> to vector<1xf32>
    %6 = vector.shape_cast %5 : vector<1xf32> to vector<1x1xf32>
    %7 = vector.broadcast %6 : vector<1x1xf32> to vector<1x128xf32>
    %8 = arith.divf %4, %7 : vector<1x128xf32>
    %cst_5 = arith.constant 5.000000e-01 : f32
    %9 = vector.broadcast %cst_5 : f32 to vector<1x128xf32>
    %10 = arith.mulf %9, %2 : vector<1x128xf32>
    %11 = arith.subf %0, %10 : vector<1x128xf32>
    %cst_6 = arith.constant 5.000000e-01 : f32
    %12 = vector.broadcast %cst_6 : f32 to vector<1x128xf32>
    %13 = arith.mulf %12, %3 : vector<1x128xf32>
    %14 = arith.subf %1, %13 : vector<1x128xf32>
    %cst_7 = arith.constant 5.000000e-01 : f32
    %15 = vector.broadcast %cst_7 : f32 to vector<1x128xf32>
    %16 = arith.mulf %15, %2 : vector<1x128xf32>
    %17 = arith.addf %0, %16 : vector<1x128xf32>
    %cst_8 = arith.constant 5.000000e-01 : f32
    %18 = vector.broadcast %cst_8 : f32 to vector<1x128xf32>
    %19 = arith.mulf %18, %3 : vector<1x128xf32>
    %20 = arith.addf %1, %19 : vector<1x128xf32>
    %21 = arith.subf %17, %11 : vector<1x128xf32>
    %22 = arith.subf %20, %14 : vector<1x128xf32>
    %23 = arith.mulf %21, %22 : vector<1x128xf32>
    %cst_9 = arith.constant 0.000000e+00 : f32
    %24 = vector.broadcast %cst_9 : f32 to vector<1x128xf32>
    %25 = arith.subf %24, %17 : vector<1x128xf32>
    %cst_10 = arith.constant 0.000000e+00 : f32
    %26 = vector.broadcast %cst_10 : f32 to vector<1x128xf32>
    %27 = arith.subf %26, %20 : vector<1x128xf32>
    %cst_11 = arith.constant 0.000000e+00 : f32
    %28 = vector.broadcast %cst_11 : f32 to vector<3x128xf32>
    %29 = tpu.concatenate %11, %14, %25, %27, %23, %28 in 0 : vector<1x128xf32>, vector<1x128xf32>, vector<1x128xf32>, vector<1x128xf32>, vector<1x128xf32>, vector<3x128xf32> -> vector<8x128xf32>
    %30 = tpu.iota {dimensions = array<i32: 1>} : vector<1x128xi32>
    %31 = tpu.iota {dimensions = array<i32: 0>} : vector<8x1xi32>
    %c2_i32 = arith.constant 2 : i32
    %32 = vector.broadcast %c2_i32 : i32 to vector<8x1xi32>
    %33 = arith.cmpi slt, %31, %32 : vector<8x1xi32>
    %c4_i32 = arith.constant 4 : i32
    %34 = vector.broadcast %c4_i32 : i32 to vector<8x1xi32>
    %35 = arith.cmpi slt, %31, %34 : vector<8x1xi32>
    %cst_12 = arith.constant -1.000000e+00 : f32
    %cst_13 = arith.constant 0.000000e+00 : f32
    %36 = vector.broadcast %cst_12 : f32 to vector<8x1xf32>
    %37 = vector.broadcast %cst_13 : f32 to vector<8x1xf32>
    %38 = arith.select %35, %36, %37 : vector<8x1xi1>, vector<8x1xf32>
    %cst_14 = arith.constant 1.000000e+00 : f32
    %39 = vector.broadcast %cst_14 : f32 to vector<8x1xf32>
    %40 = arith.select %33, %39, %38 : vector<8x1xi1>, vector<8x1xf32>
    %c4_i32_15 = arith.constant 4 : i32
    %41 = vector.broadcast %c4_i32_15 : i32 to vector<8x1xi32>
    %42 = arith.cmpi eq, %31, %41 : vector<8x1xi32>
    %43 = arith.extui %42 : vector<8x1xi1> to vector<8x1xi32>
    %44 = arith.sitofp %43 : vector<8x1xi32> to vector<8x1xf32>
    %cst_16 = arith.constant 5.000000e-01 : f32
    %45 = vector.broadcast %cst_16 : f32 to vector<1x128xf32>
    %46 = arith.cmpf oge, %8, %45 : vector<1x128xf32>
    %cst_17 = arith.constant 0xFF800000 : f32
    %47 = vector.broadcast %cst_17 : f32 to vector<1x128xf32>
    %48 = arith.select %46, %8, %47 : vector<1x128xi1>, vector<1x128xf32>
    %cst_18 = arith.constant dense<0xFF800000> : vector<1xf32>
    %49 = vector.multi_reduction <maximumf>, %48, %cst_18 [1] : vector<1x128xf32> to vector<1xf32>
    %50 = vector.shape_cast %49 : vector<1xf32> to vector<1x1xf32>
    %cst_19 = arith.constant 0.000000e+00 : f32
    %51 = vector.broadcast %cst_19 : f32 to vector<8x128xf32>
    %cst_20 = arith.constant 0xFF800000 : f32
    %c0_i32 = arith.constant 0 : i32
    %52:4 = scf.while (%arg3 = %c0_i32, %arg4 = %50, %arg5 = %48, %arg6 = %51) : (i32, vector<1x1xf32>, vector<1x128xf32>, vector<8x128xf32>) -> (i32, vector<1x1xf32>, vector<1x128xf32>, vector<8x128xf32>) {
      %c128_i32 = arith.constant 128 : i32
      %55 = arith.cmpi slt, %arg3, %c128_i32 : i32
      %56 = vector.extract %arg4[0, 0] : f32 from vector<1x1xf32>
      %cst_25 = arith.constant 5.000000e-01 : f32
      %57 = arith.cmpf oge, %56, %cst_25 : f32
      %58 = arith.andi %55, %57 : i1
      scf.condition(%58) %arg3, %arg4, %arg5, %arg6 : i32, vector<1x1xf32>, vector<1x128xf32>, vector<8x128xf32>
    } do {
    ^bb0(%arg3: i32, %arg4: vector<1x1xf32>, %arg5: vector<1x128xf32>, %arg6: vector<8x128xf32>):
      %55 = vector.broadcast %arg4 : vector<1x1xf32> to vector<1x128xf32>
      %56 = arith.cmpf oge, %arg5, %55 : vector<1x128xf32>
      %c128_i32 = arith.constant 128 : i32
      %57 = vector.broadcast %c128_i32 : i32 to vector<1x128xi32>
      %58 = arith.select %56, %30, %57 : vector<1x128xi1>, vector<1x128xi32>
      %cst_25 = arith.constant dense<2147483647> : vector<1xi32>
      %59 = vector.multi_reduction <minsi>, %58, %cst_25 [1] : vector<1x128xi32> to vector<1xi32>
      %60 = vector.shape_cast %59 : vector<1xi32> to vector<1x1xi32>
      %61 = vector.broadcast %60 : vector<1x1xi32> to vector<1x128xi32>
      %62 = arith.cmpi eq, %30, %61 : vector<1x128xi32>
      %cst_26 = arith.constant 0.000000e+00 : f32
      %63 = vector.shape_cast %62 : vector<1x128xi1> to vector<1x128xi1>
      %64 = vector.broadcast %63 : vector<1x128xi1> to vector<8x128xi1>
      %65 = vector.broadcast %cst_26 : f32 to vector<8x128xf32>
      %66 = arith.select %64, %29, %65 : vector<8x128xi1>, vector<8x128xf32>
      %cst_27 = arith.constant dense<0.000000e+00> : vector<8xf32>
      %67 = vector.multi_reduction <add>, %66, %cst_27 [1] : vector<8x128xf32> to vector<8xf32>
      %68 = vector.shape_cast %67 : vector<8xf32> to vector<8x1xf32>
      %69 = vector.broadcast %68 : vector<8x1xf32> to vector<8x128xf32>
      %70 = arith.maximumf %29, %69 : vector<8x128xf32>
      %71 = vector.extract_strided_slice %70 {offsets = [0, 0], sizes = [1, 128], strides = [1, 1]} : vector<8x128xf32> to vector<1x128xf32>
      %72 = vector.extract_strided_slice %70 {offsets = [2, 0], sizes = [1, 128], strides = [1, 1]} : vector<8x128xf32> to vector<1x128xf32>
      %73 = arith.addf %71, %72 : vector<1x128xf32>
      %cst_28 = arith.constant 0.000000e+00 : f32
      %74 = vector.broadcast %cst_28 : f32 to vector<1x128xf32>
      %75 = arith.subf %74, %73 : vector<1x128xf32>
      %76 = vector.extract_strided_slice %70 {offsets = [1, 0], sizes = [1, 128], strides = [1, 1]} : vector<8x128xf32> to vector<1x128xf32>
      %77 = vector.extract_strided_slice %70 {offsets = [3, 0], sizes = [1, 128], strides = [1, 1]} : vector<8x128xf32> to vector<1x128xf32>
      %78 = arith.addf %76, %77 : vector<1x128xf32>
      %cst_29 = arith.constant 0.000000e+00 : f32
      %79 = vector.broadcast %cst_29 : f32 to vector<1x128xf32>
      %80 = arith.subf %79, %78 : vector<1x128xf32>
      %cst_30 = arith.constant 0.000000e+00 : f32
      %81 = vector.broadcast %cst_30 : f32 to vector<1x128xf32>
      %82 = arith.maximumf %75, %81 : vector<1x128xf32>
      %cst_31 = arith.constant 0.000000e+00 : f32
      %83 = vector.broadcast %cst_31 : f32 to vector<1x128xf32>
      %84 = arith.maximumf %80, %83 : vector<1x128xf32>
      %85 = arith.mulf %82, %84 : vector<1x128xf32>
      %86 = vector.extract_strided_slice %68 {offsets = [4, 0], sizes = [1, 1], strides = [1, 1]} : vector<8x1xf32> to vector<1x1xf32>
      %87 = vector.broadcast %86 : vector<1x1xf32> to vector<1x128xf32>
      %88 = arith.addf %23, %87 : vector<1x128xf32>
      %89 = arith.subf %88, %85 : vector<1x128xf32>
      %cst_32 = arith.constant 0.000000e+00 : f32
      %90 = vector.broadcast %cst_32 : f32 to vector<1x128xf32>
      %91 = arith.cmpf ogt, %89, %90 : vector<1x128xf32>
      %cst_33 = arith.constant 5.000000e-01 : f32
      %92 = vector.broadcast %cst_33 : f32 to vector<1x128xf32>
      %93 = arith.mulf %92, %89 : vector<1x128xf32>
      %94 = arith.cmpf ogt, %85, %93 : vector<1x128xf32>
      %95 = arith.andi %91, %94 : vector<1x128xi1>
      %96 = arith.ori %62, %95 : vector<1x128xi1>
      %97 = vector.broadcast %cst_20 : f32 to vector<1x128xf32>
      %98 = arith.select %96, %97, %arg5 : vector<1x128xi1>, vector<1x128xf32>
      %cst_34 = arith.constant dense<0xFF800000> : vector<1xf32>
      %99 = vector.multi_reduction <maximumf>, %98, %cst_34 [1] : vector<1x128xf32> to vector<1xf32>
      %100 = vector.shape_cast %99 : vector<1xf32> to vector<1x1xf32>
      %101 = arith.mulf %68, %40 : vector<8x1xf32>
      %102 = vector.broadcast %arg4 : vector<1x1xf32> to vector<8x1xf32>
      %103 = arith.mulf %102, %44 : vector<8x1xf32>
      %104 = arith.addf %101, %103 : vector<8x1xf32>
      %105 = vector.broadcast %arg3 : i32 to vector<1x128xi32>
      %106 = arith.cmpi eq, %30, %105 : vector<1x128xi32>
      %107 = vector.shape_cast %106 : vector<1x128xi1> to vector<1x128xi1>
      %108 = vector.broadcast %107 : vector<1x128xi1> to vector<8x128xi1>
      %109 = vector.shape_cast %104 : vector<8x1xf32> to vector<8x1xf32>
      %110 = vector.broadcast %109 : vector<8x1xf32> to vector<8x128xf32>
      %111 = arith.select %108, %110, %arg6 : vector<8x128xi1>, vector<8x128xf32>
      %c1_i32 = arith.constant 1 : i32
      %112 = arith.addi %arg3, %c1_i32 : i32
      scf.yield %112, %100, %98, %111 : i32, vector<1x1xf32>, vector<1x128xf32>, vector<8x128xf32>
    }
    %c0_21 = arith.constant 0 : index
    %c0_22 = arith.constant 0 : index
    %53 = vector.load %arg1[%c0_21, %c0_22] : memref<8x128xf32, #tpu.memory_space<vmem>>, vector<8x128xf32>
    tpu.vector_store %arg1[%c0_21, %c0_22], %52#3 {strides = array<i32>} : memref<8x128xf32, #tpu.memory_space<vmem>>, vector<8x128xf32>,
    %c0_23 = arith.constant 0 : index
    %c0_24 = arith.constant 0 : index
    %54 = memref.load %arg2[%c0_23, %c0_24] : memref<1x1xi32, #tpu.memory_space<smem>>
    memref.store %52#0, %arg2[%c0_23, %c0_24] : memref<1x1xi32, #tpu.memory_space<smem>>
    return
  }
}

</mosaic_0001>

<bundles_post_ra>
// kernel: tpu_custom_call.1
= control target key start
LH: loop header
LB: loop body
LE: loop exit
PB: predicated region body
PF: predicated region fallthrough
CT: control target
= control target key end

     0   :  { %8 = vsyncpa [#allocation3], 0  ;;  %s473_s0 = inlined_call_operand.hbm [shape: f32[8,128], index: 0, kind: input, shape index: {}]   ;;  %s474_s1 = inlined_call_operand.hbm [shape: f32[8,128], index: 1, kind: output, shape index: {0}]   ;;  %s475_s2 = inlined_call_operand.hbm [shape: s32[1,1], index: 2, kind: output, shape index: {1}]  }
   0x1   :  { %9 = vsyncpa [#allocation4], 0 }
   0x2   :  { %10 = vsyncpa [#allocation5], 0  ;;  %s371_s9 = smov [#allocation2]  }
   0x3   :  { %s17_s10 = sshll.u32 %s371_s9, 4  ;;  %s18_s10 = int_to_ptr.vmem [resolvable:$true] %s17_s10 }
   0x4   :  { %s277_s11 = scalar_lea.vmem %s18_s10, 128  ;;  %p282_p1 = scmp.lt.s32.totalorder %s18_s10, %s18_s10 }
   0x5   :  { %p278_p0 = scmp.ne.s32.totalorder %s18_s10, %s277_s11  ;;  %p283_p2 = scmp.lt.s32.totalorder %s277_s11, %s277_s11 }
   0x7   :  { %p284_p3 = por %p283_p2, %p282_p1 }
   0x9   :  { %p285_p4 = pnand %p284_p3, %p278_p0 }
   0xb   :  { %288 = shalt.err (!%p285_p4)
}
   0xc   :  { %20 = dma.hbm_to_vmem [thread:$0]  %s473_s0, 128, %s18_s10, [#allocation3]  }
   0xd   :  { %341 = dma.done.wait [#allocation3], 128  }
   0xe   :  { %342 = vsyncadd [#allocation3], 4294967168  ;;  %vm29_vm0 = vcmask 1040384   ;;  %v28_v0 = vld [vmem:[#allocation2 + $0x4] sm:$0x1]  ;;  %vm59_vm1 = vcmask 1041408   ;;  %v67_v31 = vlaneseq }
   0xf   :  { %v24_v1 = vld [vmem:[#allocation2] sm:$0x1]  ;;  %v25_v2 = vld [vmem:[#allocation2 + $0x1] sm:$0x1]  ;;  %v30_v3 = vsel %vm29_vm0, %v28_v0, -inf  ;;  %vm61_vm2 = vcmask 1042432  }
  0x10   :  { %v26_v4 = vld [vmem:[#allocation2 + $0x2] sm:$0x1]  ;;  %v27_v5 = vld [vmem:[#allocation2 + $0x3] sm:$0x1]  ;;  %31 = vmax.xlane.f32.xlu0 %v30_v3  ;;  %vm63_vm3 = vcmask 1043456   ;;  %vm65_vm4 = vcmask 1044480  }
  0x11   :  { %v35_v6 = vmul.f32 0.5, %v26_v4  ;;  %v37_v7 = vmul.f32 0.5, %v27_v5  ;;  %v402_v32 = vshrl.u32 %v67_v31, 7  ;;  %v372_v33 = vmov 0.0   ;;  %s415_s14 = smov 0  }
  0x12   :  { %v407_v35 = vand.u32 127, %v67_v31  ;;  %v413_v39 = vmov 0.0  }
  0x13   :  { %v36_v8 = vsub.f32 %v24_v1, %v35_v6  ;;  %v38_v9 = vsub.f32 %v25_v2, %v37_v7  ;;  %v39_v10 = vadd.f32 %v35_v6, %v24_v1  ;;  %v40_v11 = vadd.f32 %v37_v7, %v25_v2 }
  0x14   :  { %vm72_vm6 = vcmp.lt.s32.totalorder %v402_v32, 4  ;;  %vm71_vm7 = vcmp.lt.s32.totalorder %v402_v32, 2  ;;  %vm75_vm8 = vcmp.eq.s32.totalorder %v402_v32, 4 }
  0x15   :  { %v41_v12 = vsub.f32 %v39_v10, %v36_v8  ;;  %v42_v13 = vsub.f32 %v40_v11, %v38_v9  ;;  %v44_v14 = vsub.f32 0.0, %v39_v10  ;;  %v45_v15 = vsub.f32 0.0, %v40_v11 }
  0x16   :  { %v47_v16 = vrot.slane %v38_v9, 7  ;;  %v73_v34 = vsel %vm72_vm6, -1.0, %v372_v33  ;;  %v411_v37 = vsel %vm75_vm8, 1.0, %v372_v33 }
  0x17   :  { %v395_v17 = vmul.f32 %v42_v13, %v41_v12  ;;  %v50_v18 = vrot.slane %v44_v14, 6  ;;  %v53_v19 = vrot.slane %v45_v15, 5  ;;  %v409_v36 = vsel %vm71_vm7, 1.0, %v73_v34 }
  0x18   :  { %v58_v20 = vsel %vm29_vm0, %v36_v8, %v47_v16 }
  0x19   :  { %v56_v21 = vrot.slane %v395_v17, 4  ;;  %v60_v22 = vsel %vm59_vm1, %v58_v20, %v50_v18 }
  0x1a   :  { %v62_v23 = vsel %vm61_vm2, %v60_v22, %v53_v19 }
  0x1b   :  { %v64_v24 = vsel %vm63_vm3, %v62_v23, %v56_v21 }
  0x1c   :  { %v399_v25 = vsel %vm65_vm4, %v64_v24, 0.0 }
  0x99   :  { %v32_v26 = vpop.xlane.xlu0 %31 }
  0x9a   :  { %267 = vrcp.f32 %v32_v26 }
  0xa7   :  { %v268_v27 = vpop.eup %267 }
  0xa8   :  { %v34_v28 = vmul.f32 %v268_v27, %v28_v0 }
  0xaa   :  { %vm78_vm5 = vcmp.ge.f32.partialorder %v34_v28, 0.5 }
  0xab   :  { %v79_v29 = vsel %vm78_vm5, %v34_v28, -inf  }
  0xac   :  { %v80_v30 = vsel %vm29_vm0, %v79_v29, -inf }
  0xad   :  { %81 = vmax.xlane.f32.xlu0 %v80_v30 }
 0x136   :  { %v82_v38 = vpop.xlane.xlu0 %81  }
 0x137   :  { %210 = vpush %v82_v38 }
 0x168   :  { %s211_s0 = spop %210 }
 0x169   :  { %p197_p5 = scmp.ge.f32.partialorder %s211_s0, 0.5 }
 0x16a   :  { %v417_v40 = vmov (%p197_p5), 0.0   ;;  %s423_s15 = smov (%p197_p5), 0  }
 0x16b   :  { %199 = sbr.rel (!%p197_p5) target bundleno = 1021 (0x3fd), region = 38 }
 0x170 LB: > { %vm95_vm9 = vcmp.ge.f32.partialorder %v353_v29, %v357_v38  ;;  %s434_s16 = sadd.s32 1, %s361_s15   ;;  %v116_v54 = vsub.s32 0, %v402_v32  ;;  %v373_v55 = vmov 0   ;;  %v154_v61 = vstv %s361_s15  ;;  %s361_s15 = sphi %s423_s15, %s477_s15   ;;  %v357_v38 = vphi %v82_v38, %v146_v38   ;;  %v353_v29 = vphi %v79_v29, %v143_v29   ;;  %v349_v40 = vphi %v417_v40, %v476_v40  }
 0x171   : > { %v96_v41 = vsel %vm95_vm9, %v407_v35, 128  ;;  %vm155_vm13 = vcmp.eq.s32.totalorder %v407_v35, %v154_v61  ;;  %p88_p6 = scmp.lt.s32.totalorder %s434_s16, 128  ;;  %s477_s15 = smov %s434_s16 }
 0x172   : > { %v97_v42 = vsel %vm29_vm0, %v96_v41, 2147483647  ;;  %v151_v59 = vrot.slane %v357_v38, %v116_v54 }
 0x173   : > { %v99_v43 = vshra.s32 %v97_v42, 16  ;;  %v98_v45 = vand.u32 65535, %v97_v42 }
 0x174   : > { %v152_v60 = vmul.f32 %v411_v37, %v151_v59 }
 0x175   : > { %v101_v44 = vcvt.s32.f32 %v99_v43  ;;  %v100_v46 = vcvt.s32.f32 %v98_v45 }
 0x177   : > { %102 = vmin.xlane.f32.xlu0 %v101_v44 }
 0x200   : > { %v103_v47 = vpop.xlane.xlu0 %102 }
 0x201   : > { %vm104_vm10 = vcmp.eq.f32.partialorder %v101_v44, %v103_v47  ;;  %v109_v49 = vcvt.f32.s32 %v103_v47 }
 0x202   : > { %v105_v48 = vsel %vm104_vm10, %v100_v46, inf }
 0x203   : > { %106 = vmin.xlane.f32.xlu0 %v105_v48  ;;  %v110_v51 = vshll.u32 %v109_v49, 16 }
 0x28c   : > { %v107_v50 = vpop.xlane.xlu0 %106 }
 0x28d   : > { %v108_v52 = vcvt.f32.s32 %v107_v50 }
 0x28f   : > { %v111_v53 = vadd.s32 %v110_v51, %v108_v52 }
 0x291   : > { %vm112_vm11 = vcmp.eq.s32.totalorder %v407_v35, %v111_v53 }
 0x292   : > { %v113_v56 = vsel %vm112_vm11, 1, %v373_v55 }
 0x293   : > { %v117_v57 = vrot.slane %v113_v56, %v116_v54 }
 0x295   : > { %vm118_vm12 = vcmp.eq.s32.totalorder %v117_v57, 1 }
 0x296   : > { %v119_v58 = vsel %vm118_vm12, %v399_v25, 0.0 }
 0x297   : > { %120 = vadd.xlane.f32.xlu1 %v119_v58 }
 0x320   : > { %v121_v62 = vpop.xlane.xlu1 %120 }
 0x321   : > { %v122_v63 = vmax.f32 %v399_v25, %v121_v62  ;;  %v147_v0 = vmul.f32 %v121_v62, %v409_v36  ;;  %v134_v7 = vrot.slane %v121_v62, 4 }
 0x323   : > { %v124_v1 = vrot.slane %v122_v63, 2  ;;  %v153_v2 = vadd.f32 %v152_v60, %v147_v0  ;;  %v136_v9 = vadd.f32 %v134_v7, %v395_v17 }
 0x325   : > { %v126_v3 = vadd.f32 %v124_v1, %v122_v63  ;;  %v158_v4 = vsel %vm155_vm13, %v153_v2, %v349_v40  }
 0x326   : > { %v476_v40 = vmov %v158_v4 }
 0x327   : > { %v127_v5 = vsub.f32 0.0, %v126_v3 }
 0x329   : > { %v128_v6 = vmax.f32 %v127_v5, 0.0 }
 0x32b   : > { %v130_v8 = vrot.slane %v128_v6, 1 }
 0x32d   : > { %v132_v10 = vmul.f32 %v130_v8, %v128_v6 }
 0x32f   : > { %v137_v11 = vsub.f32 %v136_v9, %v132_v10 }
 0x331   : > { %v139_v12 = vmul.f32 0.5, %v137_v11  ;;  %vm138_vm14 = vcmp.gt.f32.partialorder %v137_v11, 0.0 }
 0x333   : > { %vm140_vm15 = vcmp.gt.f32.partialorder %v132_v10, %v139_v12 }
 0x334   : > { %vm141_vm1 = vmand %vm138_vm14, %vm140_vm15 }
 0x335   : > { %vm142_vm2 = vmor %vm112_vm11, %vm141_vm1 }
 0x336   : > { %v143_v29 = vsel %vm142_vm2, -inf, %v353_v29  }
 0x337   : > { %v144_v13 = vsel %vm29_vm0, %v143_v29, -inf }
 0x338   : > { %145 = vmax.xlane.f32.xlu1 %v144_v13 }
 0x3c1   : > { %v146_v38 = vpop.xlane.xlu1 %145  }
 0x3c2   : > { %212 = vpush %v146_v38 }
 0x3f3   : > { %s213_s17 = spop %212 }
 0x3f4   : > { %p90_p7 = scmp.ge.f32.partialorder %s213_s17, 0.5 }
 0x3f6   : > { %p91_p8 = pnand %p90_p7, %p88_p6 }
 0x3f7   :  { %v478_v39 = vmov (%p91_p8), %v158_v4  ;;  %s479_s14 = smov (%p91_p8), %s434_s16 }
 0x3f8   :  { %94 = sbr.rel (!%p91_p8) target bundleno = 368 (0x170), region = 44 }
 0x3fd PF:  { %160 = vst [vmem:[#allocation6] sm:$0xff] %v365_v39  ;;  %162 = sst [smem:[#allocation7]] %s369_s14  ;;  %s374_s18 = smov [#allocation6]   ;;  %s369_s14 = sphi %s415_s14, %s479_s14   ;;  %v365_v39 = vphi %v413_v39, %v478_v39  }
 0x3fe   :  { %s169_s19 = sshll.u32 %s374_s18, 4  ;;  %s170_s19 = int_to_ptr.vmem [resolvable:$true] %s169_s19 }
 0x3ff   :  { %s289_s20 = scalar_lea.vmem %s170_s19, 128  ;;  %p294_p10 = scmp.lt.s32.totalorder %s170_s19, %s170_s19 }
 0x400   :  { %p290_p9 = scmp.ne.s32.totalorder %s170_s19, %s289_s20  ;;  %p295_p11 = scmp.lt.s32.totalorder %s289_s20, %s289_s20 }
 0x402   :  { %p296_p12 = por %p295_p11, %p294_p10 }
 0x404   :  { %p297_p13 = pnand %p296_p12, %p290_p9 }
 0x406   :  { %300 = shalt.err (!%p297_p13)
}
 0x407   :  { %172 = dma.vmem_to_hbm [thread:$0]  %s170_s19, 128, %s474_s1, [#allocation4]  }
 0x408   :  { %s375_s23 = smov [#allocation7]  }
 0x409   :  { %180 = dma.smem_to_hbm %s375_s23, 16, %s475_s2, [#allocation5]  }
 0x40a   :  { %343 = dma.done.wait [#allocation4], 128  }
 0x40b   :  { %344 = vsyncadd [#allocation4], 4294967168 }
 0x40c   :  { %345 = dma.done.wait [#allocation5], 16  }
 0x40d   :  { %346 = vsyncadd [#allocation5], 4294967280 }
 0x40e   :  { %187 = sfence }
 0x40f   :  { %188 = vsyncpa [#allocation3], 1 }
 0x410   :  { %189 = vsyncpa [#allocation4], 1 }
 0x411   :  { %190 = vsyncpa [#allocation5], 1 }

</bundles_post_ra>
